<compile_context>
chip_gen: v7x
topology: tpu7x:2x2x1
jax: 0.10.0
libtpu: 0.0.40
codegen_flags: <defaults>
</compile_context>

<pallas_src>
import functools
import math

import numpy as np
import jax
import jax.numpy as jnp
from jax import lax
from jax.experimental import pallas as pl
from jax.experimental.pallas import tpu as pltpu

# Small, module-consistent hyperparameters (hidden % heads == 0, as the module requires).
NUM_HEADS = 4
HEAD_DIM = 8
HIDDEN = NUM_HEADS * HEAD_DIM   # 32
SEQ_Q = 8
SEQ_K = 8
BATCH = 2
EPS = 1e-8                      # BertLayerNorm eps from the module


def _crossatt_kernel(x_ref, ctx_ref, mask_ref,
                     wq_ref, wkv_ref, wo_ref, b2h_ref, vec_ref,
                     hmask_ref, segpool_ref, bmask_ref,
                     out_ref, *, num_heads):
    """Single-invocation kernel: whole (B, Sq, H) problem, all heads & batches at once.

    Shapes (B* = flattened batch, R = NH*B*Sk):
      x_ref    (B*Sq, H)   residual / query input          wq_ref  (H, 2H)  [Wq^T*rsqrt(d) | 0]
      ctx_ref  (B*Sk, H)   key/value input                 wkv_ref (H, 2H)  [Wk^T | Wv^T]
      mask_ref (1, B*Sk)   additive attention mask         wo_ref  (2H, H)  [0 ; Wo^T]
      b2h_ref  (2, 2H)     rows: [bq*rsqrt(d) | 0], [bk | bv]
      vec_ref  (3, H)      rows: bo, gamma, beta
      hmask_ref (R, 2H)    head block-diagonal 0/1 mask
      segpool_ref (R, R)   0/1 per-head-segment pooling matrix
      bmask_ref (B*Sq, R)  0 / -1e9 same-batch mask
    """
    x = x_ref[...]
    ctx = ctx_ref[...]
    m2 = mask_ref[...]
    wq = wq_ref[...]
    wkv = wkv_ref[...]
    wo = wo_ref[...]
    b2h = b2h_ref[...]
    vec = vec_ref[...]
    hmask = hmask_ref[...]
    segpool = segpool_ref[...]
    bmask = bmask_ref[...]

    bq = b2h[0:1, :]
    bkv = b2h[1:2, :]
    bo, gamma, beta = vec[0:1, :], vec[1:2, :], vec[2:3, :]

    # Projections (softmax scale pre-folded into wq/bq; q's V-half stays exactly zero).
    q = jnp.dot(x, wq, preferred_element_type=jnp.float32) + bq        # (B*Sq, 2H)
    kv = jnp.dot(ctx, wkv, preferred_element_type=jnp.float32) + bkv   # (B*Sk, 2H)

    # Head expansion: replicate KV over heads once, zero the columns outside each head.
    kv_exp = jnp.concatenate([kv] * num_heads, axis=0) * hmask          # (R, 2H)

    # Scores for every (batch, head, query, key) in ONE MXU op (rhs-transposed contraction);
    # q's zero V-half means only the K columns contribute.
    s = lax.dot_general(q, kv_exp, (((1,), (1,)), ((), ())),
                        preferred_element_type=jnp.float32)             # (B*Sq, R)
    s = s + bmask + jnp.concatenate([m2] * num_heads, axis=1)

    # Segmented softmax: one global row max (constant per-row shift cancels in softmax),
    # per-(batch,head) sums via a 0/1 pooling matmul, reciprocal on the EUP.
    s = s - jnp.max(s, axis=-1, keepdims=True)
    e = jnp.exp(s)
    denom = jnp.dot(e, segpool, preferred_element_type=jnp.float32)     # segment sums, in place
    p = e * pl.reciprocal(denom, approx=True)

    # Each head's V projected through its slice of Wo, then one matmul mixes all heads,
    # batches and the output projection. Cross-batch probabilities are exactly zero.
    vwo = jnp.dot(kv_exp, wo, preferred_element_type=jnp.float32)       # (R, H)
    h = x + bo + jnp.dot(p, vwo, preferred_element_type=jnp.float32)    # (B*Sq, H)

    # LayerNorm (biased variance, eps=1e-8), rsqrt on the EUP.
    mu = jnp.mean(h, axis=-1, keepdims=True)
    hc = h - mu
    var = jnp.mean(hc * hc, axis=-1, keepdims=True)
    out_ref[...] = hc * lax.rsqrt(var + EPS) * gamma + beta


@functools.lru_cache(maxsize=None)
def _structural_constants(batch, seq_q, seq_k, num_heads, head_dim):
    """Static structural masks shared by every call at these shapes (host-built once)."""
    hidden = num_heads * head_dim
    bsk = batch * seq_k
    rows = num_heads * bsk                                  # R = NH * B * Sk

    r = np.arange(rows)[:, None]
    c = np.arange(2 * hidden)[None, :]
    hmask = ((c % hidden) // head_dim == r // bsk).astype(np.float32)        # (R, 2H)

    a = np.arange(rows)
    segpool = (a[:, None] // bsk == a[None, :] // bsk).astype(np.float32)    # (R, R)

    qr = np.arange(batch * seq_q)[:, None]
    kc = np.arange(rows)[None, :]
    bmask = np.where(qr // seq_q == (kc % bsk) // seq_k, 0.0, -1e9).astype(np.float32)

    return jnp.asarray(hmask), jnp.asarray(segpool), jnp.asarray(bmask)


def prepare_params(params):
    """One-time conversion from PyTorch (out, in) Linear layout to the kernel layout."""
    H = HIDDEN
    scale = 1.0 / math.sqrt(HEAD_DIM)
    zeros_hh = jnp.zeros((H, H), jnp.float32)
    wq_t = jnp.asarray(params["wq"], jnp.float32).T * scale
    wq_pad = jnp.concatenate([wq_t, zeros_hh], axis=1)                       # (H, 2H)
    wkv_t = jnp.concatenate([jnp.asarray(params["wk"], jnp.float32).T,
                             jnp.asarray(params["wv"], jnp.float32).T], axis=1)  # (H, 2H)
    wo_pad = jnp.concatenate([zeros_hh,
                              jnp.asarray(params["wo"], jnp.float32).T], axis=0)  # (2H, H)
    bq_pad = jnp.concatenate([jnp.asarray(params["bq"], jnp.float32) * scale,
                              jnp.zeros((H,), jnp.float32)])                 # (2H,)
    bkv = jnp.concatenate([jnp.asarray(params["bk"], jnp.float32),
                           jnp.asarray(params["bv"], jnp.float32)])          # (2H,)
    b2h = jnp.stack([bq_pad, bkv], axis=0)                                   # (2, 2H)
    vec = jnp.stack([params["bo"], params["gamma"], params["beta"]],
                    axis=0).astype(jnp.float32)                              # (3, H)
    return {"wq_pad": wq_pad, "wkv_t": wkv_t, "wo_pad": wo_pad, "b2h": b2h, "vec": vec}


def bert_crossatt_layer(x, ctx, kparams, ctx_att_mask=None):
    """x: (B, Sq, H) f32, ctx: (B, Sk, H) f32, ctx_att_mask: None or additive mask
    broadcastable to (B, Sk). kparams: output of prepare_params()."""
    B, Sq, H = x.shape
    _, Sk, _ = ctx.shape
    if ctx_att_mask is None:
        mask2 = jnp.zeros((1, B * Sk), jnp.float32)
    else:
        # TODO(synk): per-query (B,1,Sq,Sk) masks are not supported; only (B, Sk)-broadcastable.
        mask2 = jnp.asarray(ctx_att_mask, jnp.float32).reshape(1, B * Sk)

    hmask, segpool, bmask = _structural_constants(B, Sq, Sk, NUM_HEADS, HEAD_DIM)
    x2 = x.reshape(B * Sq, H)
    ctx2 = ctx.reshape(B * Sk, H)

    kernel = functools.partial(_crossatt_kernel, num_heads=NUM_HEADS)
    vmem = lambda: pl.BlockSpec(memory_space=pltpu.MemorySpace.VMEM)

    out2 = pl.pallas_call(
        kernel,
        out_shape=jax.ShapeDtypeStruct((B * Sq, H), jnp.float32),
        in_specs=[vmem() for _ in range(11)],
        out_specs=vmem(),
    )(x2, ctx2, mask2,
      kparams["wq_pad"], kparams["wkv_t"], kparams["wo_pad"],
      kparams["b2h"], kparams["vec"], hmask, segpool, bmask)
    return out2.reshape(B, Sq, H)


def _reference(x, ctx, p, mask=None):
    """Plain-JAX reference mirroring the PyTorch forward (dropout p=0)."""
    B, Sq, H = x.shape
    Sk = ctx.shape[1]
    q = x @ p["wq"].T + p["bq"]
    k = ctx @ p["wk"].T + p["bk"]
    v = ctx @ p["wv"].T + p["bv"]
    qh = q.reshape(B, Sq, NUM_HEADS, HEAD_DIM).transpose(0, 2, 1, 3)
    kh = k.reshape(B, Sk, NUM_HEADS, HEAD_DIM).transpose(0, 2, 1, 3)
    vh = v.reshape(B, Sk, NUM_HEADS, HEAD_DIM).transpose(0, 2, 1, 3)
    scores = jnp.einsum("bhqd,bhkd->bhqk", qh, kh) / math.sqrt(HEAD_DIM)
    if mask is not None:
        scores = scores + mask.reshape(B, 1, 1, Sk)
    probs = jax.nn.softmax(scores, axis=-1)
    ctx_layer = jnp.einsum("bhqk,bhkd->bhqd", probs, vh)
    attn = ctx_layer.transpose(0, 2, 1, 3).reshape(B, Sq, H)
    h = attn @ p["wo"].T + p["bo"] + x
    mu = h.mean(-1, keepdims=True)
    var = ((h - mu) ** 2).mean(-1, keepdims=True)
    return (h - mu) / jnp.sqrt(var + EPS) * p["gamma"] + p["beta"]


if __name__ == "__main__":
    key = jax.random.PRNGKey(0)
    keys = jax.random.split(key, 12)

    def w(k, shape, scale=0.02):
        return (scale * jax.random.normal(k, shape)).astype(jnp.float32)

    # Deterministic synthetic parameters (PyTorch Linear layout: W is (out, in)).
    params = {
        "wq": w(keys[0], (HIDDEN, HIDDEN)), "bq": w(keys[1], (HIDDEN,)),
        "wk": w(keys[2], (HIDDEN, HIDDEN)), "bk": w(keys[3], (HIDDEN,)),
        "wv": w(keys[4], (HIDDEN, HIDDEN)), "bv": w(keys[5], (HIDDEN,)),
        "wo": w(keys[6], (HIDDEN, HIDDEN)), "bo": w(keys[7], (HIDDEN,)),
        "gamma": 1.0 + w(keys[8], (HIDDEN,)),   # LayerNorm weight (around 1)
        "beta": w(keys[9], (HIDDEN,)),          # LayerNorm bias (around 0)
    }
    kparams = prepare_params(params)            # one-time layout prep (not per call)

    x = jax.random.normal(keys[10], (BATCH, SEQ_Q, HIDDEN), jnp.float32)
    ctx = jax.random.normal(keys[11], (BATCH, SEQ_K, HIDDEN), jnp.float32)

    out = bert_crossatt_layer(x, ctx, kparams, ctx_att_mask=None)
    out = jax.block_until_ready(out)

    ref = _reference(x, ctx, params, mask=None)
    assert out.shape == (BATCH, SEQ_Q, HIDDEN)
    # tolerance 1e-3: EUP approx-reciprocal in the softmax normalization
    assert jnp.allclose(out, ref, atol=1e-3, rtol=1e-3), "Pallas output mismatch vs reference"

    # also sanity-check the masked path
    mask = -10000.0 * (jax.random.uniform(keys[0], (BATCH, SEQ_K)) < 0.3).astype(jnp.float32)
    out_m = jax.block_until_ready(bert_crossatt_layer(x, ctx, kparams, ctx_att_mask=mask))
    ref_m = _reference(x, ctx, params, mask=mask)
    assert jnp.allclose(out_m, ref_m, atol=1e-3, rtol=1e-3), "Pallas masked output mismatch"

    print("KERNEL_OK")
</pallas_src>

<mosaic_0001>
module attributes {stable_mosaic.version = 11 : i64} {
  func.func @_crossatt_kernel(%arg0: memref<16x32xf32, #tpu.memory_space<vmem>>, %arg1: memref<16x32xf32, #tpu.memory_space<vmem>>, %arg2: memref<1x16xf32, #tpu.memory_space<vmem>>, %arg3: memref<32x64xf32, #tpu.memory_space<vmem>>, %arg4: memref<32x64xf32, #tpu.memory_space<vmem>>, %arg5: memref<64x32xf32, #tpu.memory_space<vmem>>, %arg6: memref<2x64xf32, #tpu.memory_space<vmem>>, %arg7: memref<3x32xf32, #tpu.memory_space<vmem>>, %arg8: memref<64x64xf32, #tpu.memory_space<vmem>>, %arg9: memref<64x64xf32, #tpu.memory_space<vmem>>, %arg10: memref<16x64xf32, #tpu.memory_space<vmem>>, %arg11: memref<16x32xf32, #tpu.memory_space<vmem>>) attributes {dimension_semantics = [], scalar_prefetch = 0 : i64, scratch_operands = 0 : i64, tpu.core_type = #tpu.core_type<tc>} {
    %c0 = arith.constant 0 : index
    %c0_0 = arith.constant 0 : index
    %0 = vector.load %arg0[%c0, %c0_0] : memref<16x32xf32, #tpu.memory_space<vmem>>, vector<16x32xf32>
    %c0_1 = arith.constant 0 : index
    %c0_2 = arith.constant 0 : index
    %1 = vector.load %arg1[%c0_1, %c0_2] : memref<16x32xf32, #tpu.memory_space<vmem>>, vector<16x32xf32>
    %c0_3 = arith.constant 0 : index
    %c0_4 = arith.constant 0 : index
    %2 = vector.load %arg2[%c0_3, %c0_4] : memref<1x16xf32, #tpu.memory_space<vmem>>, vector<1x16xf32>
    %c0_5 = arith.constant 0 : index
    %c0_6 = arith.constant 0 : index
    %3 = vector.load %arg3[%c0_5, %c0_6] : memref<32x64xf32, #tpu.memory_space<vmem>>, vector<32x64xf32>
    %c0_7 = arith.constant 0 : index
    %c0_8 = arith.constant 0 : index
    %4 = vector.load %arg4[%c0_7, %c0_8] : memref<32x64xf32, #tpu.memory_space<vmem>>, vector<32x64xf32>
    %c0_9 = arith.constant 0 : index
    %c0_10 = arith.constant 0 : index
    %5 = vector.load %arg5[%c0_9, %c0_10] : memref<64x32xf32, #tpu.memory_space<vmem>>, vector<64x32xf32>
    %c0_11 = arith.constant 0 : index
    %c0_12 = arith.constant 0 : index
    %6 = vector.load %arg6[%c0_11, %c0_12] : memref<2x64xf32, #tpu.memory_space<vmem>>, vector<2x64xf32>
    %c0_13 = arith.constant 0 : index
    %c0_14 = arith.constant 0 : index
    %7 = vector.load %arg7[%c0_13, %c0_14] : memref<3x32xf32, #tpu.memory_space<vmem>>, vector<3x32xf32>
    %c0_15 = arith.constant 0 : index
    %c0_16 = arith.constant 0 : index
    %8 = vector.load %arg8[%c0_15, %c0_16] : memref<64x64xf32, #tpu.memory_space<vmem>>, vector<64x64xf32>
    %c0_17 = arith.constant 0 : index
    %c0_18 = arith.constant 0 : index
    %9 = vector.load %arg9[%c0_17, %c0_18] : memref<64x64xf32, #tpu.memory_space<vmem>>, vector<64x64xf32>
    %c0_19 = arith.constant 0 : index
    %c0_20 = arith.constant 0 : index
    %10 = vector.load %arg10[%c0_19, %c0_20] : memref<16x64xf32, #tpu.memory_space<vmem>>, vector<16x64xf32>
    %11 = vector.extract_strided_slice %6 {offsets = [0, 0], sizes = [1, 64], strides = [1, 1]} : vector<2x64xf32> to vector<1x64xf32>
    %12 = vector.extract_strided_slice %6 {offsets = [1, 0], sizes = [1, 64], strides = [1, 1]} : vector<2x64xf32> to vector<1x64xf32>
    %13 = vector.extract_strided_slice %7 {offsets = [0, 0], sizes = [1, 32], strides = [1, 1]} : vector<3x32xf32> to vector<1x32xf32>
    %14 = vector.extract_strided_slice %7 {offsets = [1, 0], sizes = [1, 32], strides = [1, 1]} : vector<3x32xf32> to vector<1x32xf32>
    %15 = vector.extract_strided_slice %7 {offsets = [2, 0], sizes = [1, 32], strides = [1, 1]} : vector<3x32xf32> to vector<1x32xf32>
    %cst = arith.constant dense<0.000000e+00> : vector<16x64xf32>
    %16 = tpu.matmul %0, %3, %cst {dimension_numbers = #tpu.dot_dimension_numbers<[1], [0], [0], [1], [0, 0, 1, 1], [], []>} : vector<16x32xf32>, vector<32x64xf32>, vector<16x64xf32> -> vector<16x64xf32>
    %17 = vector.broadcast %11 : vector<1x64xf32> to vector<16x64xf32>
    %18 = arith.addf %16, %17 : vector<16x64xf32>
    %cst_21 = arith.constant dense<0.000000e+00> : vector<16x64xf32>
    %19 = tpu.matmul %1, %4, %cst_21 {dimension_numbers = #tpu.dot_dimension_numbers<[1], [0], [0], [1], [0, 0, 1, 1], [], []>} : vector<16x32xf32>, vector<32x64xf32>, vector<16x64xf32> -> vector<16x64xf32>
    %20 = vector.broadcast %12 : vector<1x64xf32> to vector<16x64xf32>
    %21 = arith.addf %19, %20 : vector<16x64xf32>
    %22 = tpu.concatenate %21, %21, %21, %21 in 0 : vector<16x64xf32>, vector<16x64xf32>, vector<16x64xf32>, vector<16x64xf32> -> vector<64x64xf32>
    %23 = arith.mulf %22, %8 : vector<64x64xf32>
    %cst_22 = arith.constant dense<0.000000e+00> : vector<16x64xf32>
    %24 = tpu.matmul %18, %23, %cst_22 {dimension_numbers = #tpu.dot_dimension_numbers<[1], [1], [0], [0], [0, 0, 1, 0], [], []>} : vector<16x64xf32>, vector<64x64xf32>, vector<16x64xf32> -> vector<16x64xf32>
    %25 = arith.addf %24, %10 : vector<16x64xf32>
    %26 = tpu.concatenate %2, %2, %2, %2 in 1 : vector<1x16xf32>, vector<1x16xf32>, vector<1x16xf32>, vector<1x16xf32> -> vector<1x64xf32>
    %27 = vector.broadcast %26 : vector<1x64xf32> to vector<16x64xf32>
    %28 = arith.addf %25, %27 : vector<16x64xf32>
    %cst_23 = arith.constant dense<0xFF800000> : vector<16xf32>
    %29 = vector.multi_reduction <maximumf>, %28, %cst_23 [1] : vector<16x64xf32> to vector<16xf32>
    %30 = vector.shape_cast %29 : vector<16xf32> to vector<16x1xf32>
    %31 = vector.broadcast %30 : vector<16x1xf32> to vector<16x64xf32>
    %32 = arith.subf %28, %31 : vector<16x64xf32>
    %33 = math.exp %32 : vector<16x64xf32>
    %cst_24 = arith.constant dense<0.000000e+00> : vector<16x64xf32>
    %34 = tpu.matmul %33, %9, %cst_24 {dimension_numbers = #tpu.dot_dimension_numbers<[1], [0], [0], [1], [0, 0, 1, 1], [], []>} : vector<16x64xf32>, vector<64x64xf32>, vector<16x64xf32> -> vector<16x64xf32>
    %35 = tpu.reciprocal %34 {approx = true} : vector<16x64xf32> -> vector<16x64xf32>
    %36 = arith.mulf %33, %35 : vector<16x64xf32>
    %cst_25 = arith.constant dense<0.000000e+00> : vector<64x32xf32>
    %37 = tpu.matmul %23, %5, %cst_25 {dimension_numbers = #tpu.dot_dimension_numbers<[1], [0], [0], [1], [0, 0, 1, 1], [], []>} : vector<64x64xf32>, vector<64x32xf32>, vector<64x32xf32> -> vector<64x32xf32>
    %38 = vector.broadcast %13 : vector<1x32xf32> to vector<16x32xf32>
    %39 = arith.addf %0, %38 : vector<16x32xf32>
    %cst_26 = arith.constant dense<0.000000e+00> : vector<16x32xf32>
    %40 = tpu.matmul %36, %37, %cst_26 {dimension_numbers = #tpu.dot_dimension_numbers<[1], [0], [0], [1], [0, 0, 1, 1], [], []>} : vector<16x64xf32>, vector<64x32xf32>, vector<16x32xf32> -> vector<16x32xf32>
    %41 = arith.addf %39, %40 : vector<16x32xf32>
    %cst_27 = arith.constant dense<0.000000e+00> : vector<16xf32>
    %42 = vector.multi_reduction <add>, %41, %cst_27 [1] : vector<16x32xf32> to vector<16xf32>
    %43 = vector.shape_cast %42 : vector<16xf32> to vector<16x1xf32>
    %cst_28 = arith.constant 3.200000e+01 : f32
    %44 = vector.broadcast %cst_28 : f32 to vector<16x1xf32>
    %45 = arith.divf %43, %44 : vector<16x1xf32>
    %46 = vector.broadcast %45 : vector<16x1xf32> to vector<16x32xf32>
    %47 = arith.subf %41, %46 : vector<16x32xf32>
    %48 = arith.mulf %47, %47 : vector<16x32xf32>
    %cst_29 = arith.constant dense<0.000000e+00> : vector<16xf32>
    %49 = vector.multi_reduction <add>, %48, %cst_29 [1] : vector<16x32xf32> to vector<16xf32>
    %50 = vector.shape_cast %49 : vector<16xf32> to vector<16x1xf32>
    %cst_30 = arith.constant 3.200000e+01 : f32
    %51 = vector.broadcast %cst_30 : f32 to vector<16x1xf32>
    %52 = arith.divf %50, %51 : vector<16x1xf32>
    %cst_31 = arith.constant 9.99999993E-9 : f32
    %53 = vector.broadcast %cst_31 : f32 to vector<16x1xf32>
    %54 = arith.addf %52, %53 : vector<16x1xf32>
    %55 = math.rsqrt %54 : vector<16x1xf32>
    %56 = vector.broadcast %55 : vector<16x1xf32> to vector<16x32xf32>
    %57 = arith.mulf %47, %56 : vector<16x32xf32>
    %58 = vector.broadcast %14 : vector<1x32xf32> to vector<16x32xf32>
    %59 = arith.mulf %57, %58 : vector<16x32xf32>
    %60 = vector.broadcast %15 : vector<1x32xf32> to vector<16x32xf32>
    %61 = arith.addf %59, %60 : vector<16x32xf32>
    %c0_32 = arith.constant 0 : index
    %c0_33 = arith.constant 0 : index
    %62 = vector.load %arg11[%c0_32, %c0_33] : memref<16x32xf32, #tpu.memory_space<vmem>>, vector<16x32xf32>
    tpu.vector_store %arg11[%c0_32, %c0_33], %61 {strides = array<i32>} : memref<16x32xf32, #tpu.memory_space<vmem>>, vector<16x32xf32>,
    return
  }
}

</mosaic_0001>

<bundles_post_ra>
// kernel: tpu_custom_call.1
= control target key start
LH: loop header
LB: loop body
LE: loop exit
PB: predicated region body
PF: predicated region fallthrough
CT: control target
= control target key end

     0   :  { %16 = vsyncpa [#allocation3], 0  ;;  %s1710_s0 = inlined_call_operand.hbm [shape: f32[16,32], index: 0, kind: input, shape index: {}]   ;;  %s1711_s1 = inlined_call_operand.hbm [shape: f32[16,32], index: 1, kind: input, shape index: {}]   ;;  %s1712_s2 = inlined_call_operand.hbm [shape: f32[1,16], index: 2, kind: input, shape index: {}]   ;;  %s1713_s3 = inlined_call_operand.hbm [shape: f32[32,64], index: 3, kind: input, shape index: {}]   ;;  %s1714_s4 = inlined_call_operand.hbm [shape: f32[32,64], index: 4, kind: input, shape index: {}]   ;;  %s1715_s5 = inlined_call_operand.vmem [shape: f32[64,32], index: 5, kind: input, shape index: {}]   ;;  %s1716_s6 = inlined_call_operand.vmem [shape: f32[2,64], index: 6, kind: input, shape index: {}]   ;;  %s1717_s7 = inlined_call_operand.hbm [shape: f32[3,32], index: 7, kind: input, shape index: {}]   ;;  %s1718_s8 = inlined_call_operand.vmem [shape: f32[64,64], index: 8, kind: input, shape index: {}]   ;;  %s1719_s9 = inlined_call_operand.vmem [shape: f32[64,64], index: 9, kind: input, shape index: {}]   ;;  %s1720_s10 = inlined_call_operand.hbm [shape: f32[16,64], index: 10, kind: input, shape index: {}]   ;;  %s1721_s11 = inlined_call_operand.hbm [shape: f32[16,32], index: 11, kind: output, shape index: {}]  }
   0x1   :  { %17 = vsyncpa [#allocation6], 0 }
   0x2   :  { %18 = vsyncpa [#allocation9], 0 }
   0x3   :  { %19 = vsyncpa [#allocation12], 0 }
   0x4   :  { %20 = vsyncpa [#allocation4], 0  ;;  %s1323_s17 = smov [#allocation5]   ;;  %s1324_s19 = smov [#allocation8]  }
   0x5   :  { %s38_s18 = sshll.u32 %s1323_s17, 4  ;;  %s60_s20 = sshll.u32 %s1324_s19, 4  ;;  %s39_s18 = int_to_ptr.vmem [resolvable:$true] %s38_s18  ;;  %s1396_s20 = int_to_ptr.vmem [resolvable:$true] %s60_s20 }
   0x6   :  { %s1137_s23 = scalar_lea.hbm %s1711_s1, 256 }
   0x7   :  { %p1138_p0 = scmp.ne.s32.totalorder %s1711_s1, %s1137_s23  ;;  %p1141_p1 = scmp.lt.u32.totalorder %s1137_s23, %s1711_s1 }
   0x9   :  { %p1143_p2 = pnand %p1141_p1, %p1138_p0 }
   0xb   :  { %1146 = shalt.err (!%p1143_p2)
}
   0xc   :  { %s1147_s28 = scalar_lea.vmem %s39_s18, 256  ;;  %p1152_p4 = scmp.lt.s32.totalorder %s39_s18, %s39_s18 }
   0xd   :  { %p1148_p3 = scmp.ne.s32.totalorder %s39_s18, %s1147_s28  ;;  %p1153_p5 = scmp.lt.s32.totalorder %s1147_s28, %s1147_s28 }
   0xf   :  { %p1154_p6 = por %p1153_p5, %p1152_p4 }
  0x11   :  { %p1155_p7 = pnand %p1154_p6, %p1148_p3 }
  0x13   :  { %1158 = shalt.err (!%p1155_p7)
}
  0x14   :  { %s1325_s29 = smov 128   ;;  %s1326_s30 = smov 8  }
  0x15   :  { %44 = dma.hbm_to_vmem [thread:$0]  %s1711_s1, 256, %s39_s18, [#allocation6], %s1325_s29, %s1325_s29, %s1326_s30  }
  0x16   :  { %s1159_s16 = scalar_lea.hbm %s1713_s3, 512 }
  0x17   :  { %p1160_p8 = scmp.ne.s32.totalorder %s1713_s3, %s1159_s16  ;;  %p1163_p9 = scmp.lt.u32.totalorder %s1159_s16, %s1713_s3 }
  0x19   :  { %p1165_p10 = pnand %p1163_p9, %p1160_p8 }
  0x1b   :  { %1168 = shalt.err (!%p1165_p10)
}
  0x1c   :  { %s1169_s23 = scalar_lea.vmem %s1396_s20, 512  ;;  %p1174_p12 = scmp.lt.s32.totalorder %s1396_s20, %s1396_s20 }
  0x1d   :  { %p1170_p11 = scmp.ne.s32.totalorder %s1396_s20, %s1169_s23  ;;  %p1175_p13 = scmp.lt.s32.totalorder %s1169_s23, %s1169_s23 }
  0x1f   :  { %p1176_p0 = por %p1175_p13, %p1174_p12 }
  0x21   :  { %p1177_p1 = pnand %p1176_p0, %p1170_p11 }
  0x23   :  { %1180 = shalt.err (!%p1177_p1)
}
  0x24   :  { %66 = dma.hbm_to_vmem [thread:$0]  %s1713_s3, 512, %s1396_s20, [#allocation9], %s1325_s29, %s1325_s29, %s1326_s30  }
  0x25   :  { %s1327_s24 = smov [#allocation11]   ;;  %s1328_s26 = smov [#allocation2]  }
  0x26   :  { %s89_s25 = sshll.u32 %s1327_s24, 4  ;;  %s26_s27 = sshll.u32 %s1328_s26, 4  ;;  %s90_s25 = int_to_ptr.vmem [resolvable:$true] %s89_s25  ;;  %s1433_s27 = int_to_ptr.vmem [resolvable:$true] %s26_s27 }
  0x27   :  { %s1181_s13 = scalar_lea.hbm %s1717_s7, 64 }
  0x28   :  { %p1182_p2 = scmp.ne.s32.totalorder %s1717_s7, %s1181_s13  ;;  %p1185_p3 = scmp.lt.u32.totalorder %s1181_s13, %s1717_s7 }
  0x2a   :  { %p1187_p4 = pnand %p1185_p3, %p1182_p2 }
  0x2c   :  { %1190 = shalt.err (!%p1187_p4)
}
  0x2d   :  { %s1191_s3 = scalar_lea.vmem %s90_s25, 64  ;;  %p1196_p6 = scmp.lt.s32.totalorder %s90_s25, %s90_s25 }
  0x2e   :  { %p1192_p5 = scmp.ne.s32.totalorder %s90_s25, %s1191_s3  ;;  %p1197_p7 = scmp.lt.s32.totalorder %s1191_s3, %s1191_s3 }
  0x30   :  { %p1198_p8 = por %p1197_p7, %p1196_p6 }
  0x32   :  { %p1199_p9 = pnand %p1198_p8, %p1192_p5 }
  0x34   :  { %1202 = shalt.err (!%p1199_p9)
}
  0x35   :  { %92 = dma.hbm_to_vmem [thread:$0]  %s1717_s7, 64, %s90_s25, [#allocation12]  }
  0x36   :  { %s1203_s23 = scalar_lea.hbm %s1710_s0, 256 }
  0x37   :  { %p1204_p10 = scmp.ne.s32.totalorder %s1710_s0, %s1203_s23  ;;  %p1207_p11 = scmp.lt.u32.totalorder %s1203_s23, %s1710_s0 }
  0x39   :  { %p1209_p12 = pnand %p1207_p11, %p1204_p10 }
  0x3b   :  { %1212 = shalt.err (!%p1209_p12)
}
  0x3c   :  { %s1213_s28 = scalar_lea.vmem %s1433_s27, 256  ;;  %p1218_p0 = scmp.lt.s32.totalorder %s1433_s27, %s1433_s27 }
  0x3d   :  { %p1214_p13 = scmp.ne.s32.totalorder %s1433_s27, %s1213_s28  ;;  %p1219_p1 = scmp.lt.s32.totalorder %s1213_s28, %s1213_s28 }
  0x3f   :  { %p1220_p2 = por %p1219_p1, %p1218_p0 }
  0x41   :  { %p1221_p3 = pnand %p1220_p2, %p1214_p13 }
  0x43   :  { %1224 = shalt.err (!%p1221_p3)
}
  0x44   :  { %32 = dma.hbm_to_vmem [thread:$0]  %s1710_s0, 256, %s1433_s27, [#allocation3], %s1325_s29, %s1325_s29, %s1326_s30  }
  0x45   :  { %s1329_s12 = smov [#allocation7]   ;;  %s1330_s14 = smov [#allocation10]  }
  0x46   :  { %s51_s13 = sshll.u32 %s1329_s12, 4  ;;  %s72_s15 = sshll.u32 %s1330_s14, 4  ;;  %s52_s13 = int_to_ptr.vmem [resolvable:$true] %s51_s13  ;;  %s1467_s15 = int_to_ptr.vmem [resolvable:$true] %s72_s15 }
  0x47   :  { %s1225_s3 = scalar_lea.hbm %s1712_s2, 16 }
  0x48   :  { %p1226_p4 = scmp.ne.s32.totalorder %s1712_s2, %s1225_s3  ;;  %p1229_p5 = scmp.lt.u32.totalorder %s1225_s3, %s1712_s2 }
  0x4a   :  { %p1231_p6 = pnand %p1229_p5, %p1226_p4 }
  0x4c   :  { %1234 = shalt.err (!%p1231_p6)
}
  0x4d   :  { %s1235_s0 = scalar_lea.vmem %s52_s13, 16  ;;  %s1239_s27 = scalar_lea.vmem %s52_s13, 32 }
  0x4e   :  { %p1236_p7 = scmp.ne.s32.totalorder %s52_s13, %s1235_s0  ;;  %p1240_p8 = scmp.lt.s32.totalorder %s52_s13, %s52_s13 }
  0x4f   :  { %p1241_p9 = scmp.lt.s32.totalorder %s1239_s27, %s1235_s0 }
  0x51   :  { %p1242_p10 = por %p1241_p9, %p1240_p8 }
  0x53   :  { %p1243_p11 = pnand %p1242_p10, %p1236_p7 }
  0x55   :  { %1246 = shalt.err (!%p1243_p11)
}
  0x56   :  { %54 = dma.hbm_to_vmem [thread:$0]  %s1712_s2, 16, %s52_s13, [#allocation6]  }
  0x57   :  { %s1247_s26 = scalar_lea.hbm %s1714_s4, 512 }
  0x58   :  { %p1248_p12 = scmp.ne.s32.totalorder %s1714_s4, %s1247_s26  ;;  %p1251_p13 = scmp.lt.u32.totalorder %s1247_s26, %s1714_s4 }
  0x5a   :  { %p1253_p0 = pnand %p1251_p13, %p1248_p12 }
  0x5c   :  { %1256 = shalt.err (!%p1253_p0)
}
  0x5d   :  { %s1257_s14 = scalar_lea.vmem %s1467_s15, 512  ;;  %p1262_p2 = scmp.lt.s32.totalorder %s1467_s15, %s1467_s15 }
  0x5e   :  { %p1258_p1 = scmp.ne.s32.totalorder %s1467_s15, %s1257_s14  ;;  %p1263_p3 = scmp.lt.s32.totalorder %s1257_s14, %s1257_s14 }
  0x60   :  { %p1264_p4 = por %p1263_p3, %p1262_p2 }
  0x62   :  { %p1265_p5 = pnand %p1264_p4, %p1258_p1 }
  0x64   :  { %1268 = shalt.err (!%p1265_p5)
}
  0x65   :  { %78 = dma.hbm_to_vmem [thread:$0]  %s1714_s4, 512, %s1467_s15, [#allocation9], %s1325_s29, %s1325_s29, %s1326_s30  }
  0x66   :  { %s1331_s16 = smov [#allocation13]   ;;  %s1269_s19 = scalar_lea.hbm %s1720_s10, 256 }
  0x67   :  { %s102_s17 = sshll.u32 %s1331_s16, 4  ;;  %p1270_p6 = scmp.ne.s32.totalorder %s1720_s10, %s1269_s19  ;;  %s103_s17 = int_to_ptr.vmem [resolvable:$true] %s102_s17 }
  0x68   :  { %p1273_p7 = scmp.lt.u32.totalorder %s1269_s19, %s1720_s10 }
  0x6a   :  { %p1275_p8 = pnand %p1273_p7, %p1270_p6 }
  0x6c   :  { %1278 = shalt.err (!%p1275_p8)
}
  0x6d   :  { %s1279_s23 = scalar_lea.vmem %s103_s17, 256  ;;  %p1284_p10 = scmp.lt.s32.totalorder %s103_s17, %s103_s17 }
  0x6e   :  { %p1280_p9 = scmp.ne.s32.totalorder %s103_s17, %s1279_s23  ;;  %p1285_p11 = scmp.lt.s32.totalorder %s1279_s23, %s1279_s23 }
  0x70   :  { %p1286_p12 = por %p1285_p11, %p1284_p10 }
  0x72   :  { %p1287_p13 = pnand %p1286_p12, %p1280_p9 }
  0x74   :  { %1290 = shalt.err (!%p1287_p13)
}
  0x75   :  { %108 = dma.hbm_to_vmem [thread:$0]  %s1720_s10, 256, %s103_s17, [#allocation12], %s1325_s29, %s1325_s29, %s1326_s30  }
  0x76   :  { %1313 = dma.done.wait [#allocation3], 256  }
  0x77   :  { %1314 = vsyncadd [#allocation3], 4294967040 }
  0x78   :  { %1315 = dma.done.wait [#allocation6], 272  }
  0x79   :  { %1316 = vsyncadd [#allocation6], 4294967024 }
  0x7a   :  { %1317 = dma.done.wait [#allocation9], 1024  }
  0x7b   :  { %1318 = vsyncadd [#allocation9], 4294966272 }
  0x7c   :  { %1319 = dma.done.wait [#allocation12], 320  }
  0x7d   :  { %1320 = vsyncadd [#allocation12], 4294966976  ;;  %vm175_vm0 = vcmask 261120   ;;  %v139_v0 = vld [vmem:[#allocation10] sm:$0xff]  ;;  %v140_v1 = vld [vmem:[#allocation10 + $0x8] sm:$0xff]  ;;  %v171_v16 = vlaneseq  ;;  %s1332_s10 = smov 16  }
  0x7e   :  { %v141_v2 = vld [vmem:[#allocation10 + $0x10] sm:$0xff]  ;;  %v1032_v3 = vpack.c.bf16 %v140_v1, %v139_v0  ;;  %v142_v4 = vld [vmem:[#allocation10 + $0x18] sm:$0xff]  ;;  %v135_v7 = vld [vmem:[#allocation8] sm:$0xff]  ;;  %s1333_s1 = smov 48   ;;  %s1334_s18 = smov 32   ;;  %vm350_vm1 = vcmask 523264  }
  0x7f   :  { %v132_v5 = vld [vmem:[#allocation5] sm:$0xff]  ;;  %v1036_v6 = vpack.c.bf16 %v142_v4, %v141_v2  ;;  %v138_v11 = vld [vmem:[#allocation8 + $0x18] sm:$0xff]  ;;  %v1521_v15 = vld [vmem:[#allocation2 + $0x8] sm:$0xff]  ;;  %v1526_v17 = vshrl.u32 %v171_v16, 7  ;;  %vm470_vm3 = vcmask 130048   ;;  %vm473_vm4 = vcmask 392192  }
  0x80   :  { %936 = vmatprep.mubr.msk.f32.mxu1 %vm175_vm0, %v132_v5  ;;  %v136_v8 = vld [vmem:[#allocation8 + $0x8] sm:$0xff]  ;;  %v137_v9 = vld [vmem:[#allocation8 + $0x10] sm:$0xff]  ;;  %1033 = vmatprep.subr.bf16.mxu1 %v1032_v3  ;;  %v1517_v12 = vld [vmem:[#allocation2] sm:$0xff] }
  0x81   :  { %v1024_v10 = vpack.c.bf16 %v136_v8, %v135_v7  ;;  %1035 = vmatpush3.bf16.msra.mxu1 %v1032_v3  ;;  %v1028_v13 = vpack.c.bf16 %v138_v11, %v137_v9  ;;  %925 = vmatprep.mubr.msk.f32.mxu0 %vm175_vm0, %v1517_v12  ;;  %v133_v14 = vld [vmem:[#allocation5 + $0x8] sm:$0xff]  ;;  %v1529_v18 = vsub.s32 0, %v1526_v17  ;;  %v134_v19 = vld [vmem:[#allocation7] sm:$0x1]  ;;  %v259_v21 = vsub.s32 1, %v1526_v17  ;;  %v154_v24 = vld [vmem:[%s1718_s8 + $0x8] sm:$0xff] }
  0x82   :  { %1037 = vmatprep.subr.bf16.mxu1 %v1036_v6  ;;  %v151_v22 = vld [vmem:[%s1716_s6] sm:$0x3]  ;;  %v156_v26 = vld [vmem:[%s1718_s8 + $0x18] sm:$0xff]  ;;  %v155_v29 = vld [vmem:[%s1718_s8 + $0x10] sm:$0xff] }
  0x83   :  { %1025 = vmatprep.subr.bf16.mxu0 %v1024_v10  ;;  %v460_v20 = vrot.slane %v134_v19, %v1529_v18  ;;  %v260_v23 = vrot.slane %v151_v22, %v259_v21  ;;  %v153_v28 = vld [vmem:[%s1718_s8] sm:$0xff]  ;;  %v174_v31 = vrot.slane %v151_v22, %v1529_v18  ;;  %vm1561_vm2 = vmpackc.low %vm350_vm1, %vm350_vm1  ;;  %v158_v43 = vld [vmem:[%s1718_s8 + $0x28] sm:$0xff] }
  0x84   :  { %1027 = vmatpush3.bf16.msra.mxu0 %v1024_v10  ;;  %v157_v44 = vld [vmem:[%s1718_s8 + $0x20] sm:$0xff]  ;;  %v160_v48 = vld [vmem:[%s1718_s8 + $0x38] sm:$0xff]  ;;  %v159_v49 = vld [vmem:[%s1718_s8 + $0x30] sm:$0xff] }
  0x85   :  { %1029 = vmatprep.subr.bf16.mxu0 %v1028_v13  ;;  %1039 = vmatpush3.bf16.msra.mxu1 %v1036_v6  ;;  %v170_v60 = vld [vmem:[#allocation13 + $0x8] sm:$0xff]  ;;  %v169_v61 = vld [vmem:[#allocation13] sm:$0xff]  ;;  %v164_v11 = vld [vmem:[%s1719_s9 + $0x18] sm:$0xff] }
  0x86   :  { %461 = vrot.lane.b32.xlu0 %v460_v20, %s1332_s10  ;;  %467 = vrot.lane.b32.xlu1 %v460_v20, %s1333_s1  ;;  %v161_v7 = vld [vmem:[%s1719_s9] sm:$0xff]  ;;  %v162_v8 = vld [vmem:[%s1719_s9 + $0x8] sm:$0xff] }
  0x87   :  { %v1064_v9 = vpack.c.bf16 %v162_v8, %v161_v7  ;;  %v163_v10 = vld [vmem:[%s1719_s9 + $0x10] sm:$0xff]  ;;  %v166_v16 = vld [vmem:[%s1719_s9 + $0x28] sm:$0xff]  ;;  %v168_v22 = vld [vmem:[%s1719_s9 + $0x38] sm:$0xff] }
  0x88   :  { %1031 = vmatpush3.bf16.msra.mxu0 %v1028_v13  ;;  %937 = vmatmul.mubr.msk.f32.vlgmr.msra.gmra.mrb[0].mxu1 %vm175_vm0, %v133_v14  ;;  %v1068_v13 = vpack.c.bf16 %v164_v11, %v163_v10  ;;  %v165_v14 = vld [vmem:[%s1719_s9 + $0x20] sm:$0xff] }
  0x89   :  { %1065 = vmatprep.subr.bf16.mxu1 %v1064_v9 }
  0x8a   :  { %464 = vrot.lane.b32.xlu0 %v460_v20, %s1334_s18  ;;  %1067 = vmatpush3.bf16.msra.mxu1 %v1064_v9  ;;  %v1072_v20 = vpack.c.bf16 %v166_v16, %v165_v14 }
  0x8b   :  { %926 = vmatmul.mubr.msk.f32.vlgmr.msra.gmra.mrb[0].mxu0 %vm175_vm0, %v1521_v15  ;;  %1069 = vmatprep.subr.bf16.mxu1 %v1068_v13 }
  0x8e   :  { %1071 = vmatpush3.bf16.msra.mxu1 %v1068_v13 }
  0x8f   :  { %1073 = vmatprep.subr.bf16.mxu1 %v1072_v20 }
  0x92   :  { %1075 = vmatpush3.bf16.msra.mxu1 %v1072_v20 }
  0xf8   :  { %v462_v54 = vpop.permute.xlu0 %461  ;;  %v468_v58 = vpop.permute.xlu1 %467 }
  0xf9   :  { %v471_v55 = vsel %vm470_vm3, %v134_v19, %v462_v54  ;;  %v167_v19 = vld [vmem:[%s1719_s9 + $0x30] sm:$0xff] }
  0xfc   :  { %v465_v56 = vpop.permute.xlu0 %464 }
  0xfd   :  { %v472_v57 = vsel %vm175_vm0, %v471_v55, %v465_v56 }
  0xfe   :  { %v474_v59 = vsel %vm473_vm4, %v472_v57, %v468_v58 }
  0xff   :  { %v478_v63 = vrot.slane %v474_v59, %v1529_v18 }
 0x15b   :  { %v938_v25 = vpop.f32.mrb[0].mxu1 }
 0x15c   :  { %v339_v27 = vadd.f32 %v938_v25, %v260_v23  ;;  %v333_v30 = vpop.f32.mrb[1].mxu1  ;;  %v144_v25 = vld [vmem:[%s1715_s5 + $0x8] sm:$0xff] }
 0x15d   :  { %v334_v32 = vadd.f32 %v333_v30, %v260_v23  ;;  %v1076_v23 = vpack.c.bf16 %v168_v22, %v167_v19 }
 0x15e   :  { %v927_v33 = vpop.f32.mrb[0].mxu0  ;;  %v1551_v34 = vmul.f32 %v339_v27, %v154_v24  ;;  %v1553_v36 = vmul.f32 %v339_v27, %v156_v26  ;;  %v1582_v45 = vmul.f32 %v339_v27, %v158_v43  ;;  %v1598_v50 = vmul.f32 %v339_v27, %v160_v48  ;;  %v143_v24 = vld [vmem:[%s1715_s5] sm:$0xff]  ;;  %v148_v43 = vld [vmem:[%s1715_s5 + $0x28] sm:$0xff]  ;;  %v150_v48 = vld [vmem:[%s1715_s5 + $0x38] sm:$0xff] }
 0x15f   :  { %v248_v35 = vpop.f32.mrb[1].mxu0  ;;  %v1555_v37 = vmul.f32 %v334_v32, %v153_v28  ;;  %v1557_v38 = vmul.f32 %v334_v32, %v155_v29  ;;  %v1584_v46 = vmul.f32 %v334_v32, %v157_v44  ;;  %v1600_v51 = vmul.f32 %v334_v32, %v159_v49  ;;  %1077 = vmatprep.subr.bf16.mxu1 %v1076_v23 }
 0x160   :  { %v249_v40 = vadd.f32 %v248_v35, %v174_v31  ;;  %v254_v53 = vadd.f32 %v927_v33, %v174_v31  ;;  %1079 = vmatpush3.bf16.msra.mxu1 %v1076_v23  ;;  %v1080_v26 = vpack.c.bf16 %v144_v25, %v143_v24  ;;  %v145_v33 = vld [vmem:[%s1715_s5 + $0x10] sm:$0xff]  ;;  %v146_v35 = vld [vmem:[%s1715_s5 + $0x18] sm:$0xff] }
 0x161   :  { %v1040_v41 = vpack.c.bf16 %v1551_v34, %v1555_v37  ;;  %v1046_v42 = vpack.c.bf16 %v1553_v36, %v1557_v38  ;;  %v1052_v47 = vpack.c.bf16 %v1582_v45, %v1584_v46  ;;  %v1058_v52 = vpack.c.bf16 %v1598_v50, %v1600_v51 }
 0x162   :  { %955 = vmatprep.mubr.msk.f32.mxu0 %vm350_vm1, %v249_v40  ;;  %1081 = vmatprep.subr.bf16.mxu1 %v1080_v26  ;;  %v1084_v40 = vpack.c.bf16 %v146_v35, %v145_v33 }
 0x163   :  { %1042 = vmatprep.subr.msk.bf16.mxu0 %vm1561_vm2, %v1040_v41 }
 0x164   :  { %1045 = vmatpush3.bf16.xpose.msk.msra.mxu0 %vm1561_vm2, %v1040_v41 }
 0x165   :  { %1048 = vmatprep.subr.msk.bf16.mxu0 %vm1561_vm2, %v1046_v42 }
 0x16c   :  { %1051 = vmatpush3.bf16.xpose.msk.msra.mxu0 %vm1561_vm2, %v1046_v42  ;;  %v147_v42 = vld [vmem:[%s1715_s5 + $0x20] sm:$0xff] }
 0x16d   :  { %1054 = vmatprep.subr.msk.bf16.mxu0 %vm1561_vm2, %v1052_v47  ;;  %v1088_v44 = vpack.c.bf16 %v148_v43, %v147_v42 }
 0x174   :  { %1057 = vmatpush3.bf16.xpose.msk.msra.mxu0 %vm1561_vm2, %v1052_v47  ;;  %v149_v47 = vld [vmem:[%s1715_s5 + $0x30] sm:$0xff]  ;;  %s1335_s5 = smov [#allocation14]  }
 0x175   :  { %1060 = vmatprep.subr.msk.bf16.mxu0 %vm1561_vm2, %v1058_v52  ;;  %v1092_v49 = vpack.c.bf16 %v150_v48, %v149_v47  ;;  %s818_s10 = sshll.u32 %s1335_s5, 4  ;;  %s819_s10 = int_to_ptr.vmem [resolvable:$true] %s818_s10 }
 0x176   :  { %s1291_s1 = scalar_lea.vmem %s819_s10, 256  ;;  %p1296_p1 = scmp.lt.s32.totalorder %s819_s10, %s819_s10 }
 0x177   :  { %p1292_p0 = scmp.ne.s32.totalorder %s819_s10, %s1291_s1  ;;  %p1297_p2 = scmp.lt.s32.totalorder %s1291_s1, %s1291_s1 }
 0x179   :  { %p1298_p3 = por %p1297_p2, %p1296_p1 }
 0x17b   :  { %p1299_p4 = pnand %p1298_p3, %p1292_p0 }
 0x17c   :  { %1063 = vmatpush3.bf16.xpose.msk.msra.mxu0 %vm1561_vm2, %v1058_v52 }
 0x183   :  { %956 = vmatmul.mubr.msk.f32.vlgmr.msra.gmra.mrb[2].mxu0 %vm350_vm1, %v254_v53 }
 0x256   :  { %v957_v62 = vpop.f32.mrb[2].mxu0 }
 0x257   :  { %v453_v0 = vadd.f32 %v957_v62, %v170_v60  ;;  %v447_v1 = vpop.f32.mrb[3].mxu0  ;;  %v152_v62 = vld [vmem:[#allocation11] sm:$0x7] }
 0x258   :  { %v448_v2 = vadd.f32 %v447_v1, %v169_v61 }
 0x259   :  { %v480_v3 = vadd.f32 %v478_v63, %v453_v0 }
 0x25a   :  { %v479_v4 = vadd.f32 %v478_v63, %v448_v2  ;;  %v686_v63 = vrot.slane %v152_v62, %v1529_v18 }
 0x25b   :  { %v484_v5 = vsel %vm350_vm1, %v480_v3, -inf }
 0x25c   :  { %485 = vmax.xlane.f32.xlu0 %v484_v5  ;;  %v481_v6 = vsel %vm350_vm1, %v479_v4, -inf  ;;  %v688_v0 = vadd.f32 %v686_v63, %v1521_v15  ;;  %v687_v1 = vadd.f32 %v686_v63, %v1517_v12 }
 0x25d   :  { %482 = vmax.xlane.f32.xlu1 %v481_v6 }
 0x2e9   :  { %v486_v27 = vpop.xlane.xlu0 %485 }
 0x2ea   :  { %v488_v28 = vsub.f32 %v480_v3, %v486_v27  ;;  %v483_v29 = vpop.xlane.xlu1 %482  ;;  %v802_v27 = vrot.slane %v152_v62, %v259_v21 }
 0x2eb   :  { %v487_v30 = vsub.f32 %v479_v4, %v483_v29 }
 0x2ec   :  { %v491_v31 = vmul.f32 1.442695, %v488_v28 }
 0x2ed   :  { %v489_v32 = vmul.f32 1.442695, %v487_v30 }
 0x2ef   :  { %1125 = vpow2.f32 %v489_v32 }
 0x2f0   :  { %1127 = vpow2.f32 %v491_v31 }
 0x2f9   :  { %v1126_v39 = vpop.eup %1125 }
 0x2fa   :  { %v1128_v41 = vpop.eup %1127  ;;  %974 = vmatprep.mubr.msk.f32.mxu1 %vm350_vm1, %v1126_v39 }
 0x2fb   :  { %975 = vmatmul.mubr.msk.f32.vlgmr.msra.gmra.mrb[2].mxu1 %vm350_vm1, %v1128_v41 }
 0x2fc   :  { %1083 = vmatpush3.bf16.msra.mxu1 %v1080_v26  ;;  %993 = vmatprep.mubr.msk.f32.mxu1 %vm350_vm1, %v1555_v37  ;;  %v807_v26 = vsub.s32 2, %v1526_v17 }
 0x2fd   :  { %1085 = vmatprep.subr.bf16.mxu1 %v1084_v40 }
 0x2fe   :  { %v808_v30 = vrot.slane %v152_v62, %v807_v26 }
 0x300   :  { %1087 = vmatpush3.bf16.msra.mxu1 %v1084_v40 }
 0x301   :  { %1089 = vmatprep.subr.bf16.mxu1 %v1088_v44 }
 0x304   :  { %1091 = vmatpush3.bf16.msra.mxu1 %v1088_v44 }
 0x305   :  { %1093 = vmatprep.subr.bf16.mxu1 %v1092_v49 }
 0x308   :  { %1095 = vmatpush3.bf16.msra.mxu1 %v1092_v49 }
 0x30b   :  { %994 = vmatmul.mubr.msk.f32.vlgmr.msra.gmra.mrb[4].mxu1 %vm350_vm1, %v1551_v34 }
 0x30c   :  { %996 = vmatprep.mubr.msk.f32.mxu1 %vm350_vm1, %v1557_v38 }
 0x30f   :  { %997 = vmatmul.mubr.msk.f32.gmra.mrb[6].mxu1 %vm350_vm1, %v1553_v36 }
 0x310   :  { %999 = vmatprep.mubr.msk.f32.mxu1 %vm350_vm1, %v1584_v46 }
 0x313   :  { %1000 = vmatmul.mubr.msk.f32.gmra.mrb[8].mxu1 %vm350_vm1, %v1582_v45 }
 0x314   :  { %1002 = vmatprep.mubr.msk.f32.mxu1 %vm350_vm1, %v1600_v51 }
 0x317   :  { %1003 = vmatmul.mubr.msk.f32.gmra.mrb[10].mxu1 %vm350_vm1, %v1598_v50 }
 0x3ce   :  { %v976_v37 = vpop.f32.mrb[2].mxu1 }
 0x3cf   :  { %v565_v34 = vpop.f32.mrb[3].mxu1 }
 0x3d0   :  { %1129 = vrcp.f32 %v565_v34 }
 0x3d1   :  { %1131 = vrcp.f32 %v976_v37 }
 0x3da   :  { %v1130_v52 = vpop.eup %1129 }
 0x3db   :  { %v576_v38 = vmul.f32 %v1130_v52, %v1126_v39  ;;  %v1132_v60 = vpop.eup %1131 }
 0x3dc   :  { %v577_v61 = vmul.f32 %v1132_v60, %v1128_v41 }
 0x3dd   :  { %1021 = vmatprep.mubr.msk.f32.mxu0 %vm350_vm1, %v576_v38 }
 0x3de   :  { %v995_v36 = vpop.f32.mrb[4].mxu1 }
 0x3df   :  { %v644_v53 = vpop.f32.mrb[5].mxu1 }
 0x3e0   :  { %v1096_v54 = vpack.c.bf16 %v995_v36, %v644_v53 }
 0x3e2   :  { %v998_v46 = vpop.f32.mrb[6].mxu1  ;;  %1097 = vmatprep.subr.bf16.mxu0 %v1096_v54 }
 0x3e3   :  { %v654_v45 = vpop.f32.mrb[7].mxu1  ;;  %1099 = vmatpush3.bf16.msra.mxu0 %v1096_v54 }
 0x3e4   :  { %v1100_v55 = vpack.c.bf16 %v998_v46, %v654_v45 }
 0x3e6   :  { %v1001_v51 = vpop.f32.mrb[8].mxu1  ;;  %1101 = vmatprep.subr.bf16.mxu0 %v1100_v55 }
 0x3e7   :  { %v664_v56 = vpop.f32.mrb[9].mxu1  ;;  %1103 = vmatpush3.bf16.msra.mxu0 %v1100_v55 }
 0x3e8   :  { %v1104_v50 = vpack.c.bf16 %v1001_v51, %v664_v56 }
 0x3ea   :  { %v1004_v57 = vpop.f32.mrb[10].mxu1  ;;  %1105 = vmatprep.subr.bf16.mxu0 %v1104_v50 }
 0x3eb   :  { %v674_v58 = vpop.f32.mrb[11].mxu1  ;;  %1107 = vmatpush3.bf16.msra.mxu0 %v1104_v50 }
 0x3ec   :  { %v1108_v59 = vpack.c.bf16 %v1004_v57, %v674_v58 }
 0x3ee   :  { %1109 = vmatprep.subr.bf16.mxu0 %v1108_v59 }
 0x3ef   :  { %1111 = vmatpush3.bf16.msra.mxu0 %v1108_v59 }
 0x3f2   :  { %1022 = vmatmul.mubr.msk.f32.vlgmr.msra.gmra.mrb[4].mxu0 %vm350_vm1, %v577_v61 }
 0x4c5   :  { %v1023_v2 = vpop.f32.mrb[4].mxu0 }
 0x4c6   :  { %v771_v3 = vadd.f32 %v1023_v2, %v688_v0  ;;  %v761_v4 = vpop.f32.mrb[5].mxu0 }
 0x4c7   :  { %v770_v5 = vadd.f32 %v761_v4, %v687_v1 }
 0x4c8   :  { %v775_v6 = vsel %vm175_vm0, %v771_v3, 0.0 }
 0x4c9   :  { %776 = vadd.xlane.f32.xlu1 %v775_v6  ;;  %v772_v7 = vsel %vm175_vm0, %v770_v5, 0.0 }
 0x4ca   :  { %773 = vadd.xlane.f32.xlu0 %v772_v7 }
 0x556   :  { %v777_v8 = vpop.xlane.xlu1 %776 }
 0x557   :  { %v780_v9 = vmul.f32 0.03125, %v777_v8  ;;  %v774_v10 = vpop.xlane.xlu0 %773 }
 0x558   :  { %v779_v11 = vmul.f32 0.03125, %v774_v10 }
 0x559   :  { %v782_v13 = vsub.f32 %v771_v3, %v780_v9 }
 0x55a   :  { %v781_v18 = vsub.f32 %v770_v5, %v779_v11 }
 0x55b   :  { %v784_v14 = vmul.f32 %v782_v13, %v782_v13 }
 0x55c   :  { %v783_v15 = vmul.f32 %v781_v18, %v781_v18 }
 0x55d   :  { %v788_v12 = vsel %vm175_vm0, %v784_v14, 0.0 }
 0x55e   :  { %789 = vadd.xlane.f32.xlu1 %v788_v12  ;;  %v785_v16 = vsel %vm175_vm0, %v783_v15, 0.0 }
 0x55f   :  { %786 = vadd.xlane.f32.xlu0 %v785_v16 }
 0x5eb   :  { %v790_v19 = vpop.xlane.xlu1 %789 }
 0x5ec   :  { %v792_v20 = vmul.f32 0.03125, %v790_v19  ;;  %v787_v22 = vpop.xlane.xlu0 %786 }
 0x5ed   :  { %v791_v23 = vmul.f32 0.03125, %v787_v22 }
 0x5ee   :  { %v794_v24 = vadd.f32 1e-08, %v792_v20 }
 0x5ef   :  { %v793_v25 = vadd.f32 1e-08, %v791_v23 }
 0x5f0   :  { %1133 = vrsqrt.f32 %v794_v24 }
 0x5f1   :  { %1135 = vrsqrt.f32 %v793_v25 }
 0x5fa   :  { %v1134_v28 = vpop.eup %1133 }
 0x5fb   :  { %v1136_v29 = vpop.eup %1135  ;;  %v798_v31 = vmul.f32 %v1134_v28, %v782_v13 }
 0x5fc   :  { %v797_v32 = vmul.f32 %v1136_v29, %v781_v18 }
 0x5fd   :  { %v804_v33 = vmul.f32 %v802_v27, %v798_v31 }
 0x5fe   :  { %v803_v35 = vmul.f32 %v802_v27, %v797_v32 }
 0x5ff   :  { %v810_v39 = vadd.f32 %v808_v30, %v804_v33 }
 0x600   :  { %v809_v40 = vadd.f32 %v808_v30, %v803_v35 }
 0x601   :  { %812 = vst.msk [vmem:[#allocation14 + $0x8] sm:$0xff] %vm175_vm0, %v810_v39 }
 0x602   :  { %811 = vst.msk [vmem:[#allocation14] sm:$0xff] %vm175_vm0, %v809_v40 }
 0x603   :  { %1302 = shalt.err (!%p1299_p4)
}
 0x604   :  { %s1303_s26 = scalar_lea.hbm %s1721_s11, 256 }
 0x605   :  { %p1304_p5 = scmp.ne.s32.totalorder %s1721_s11, %s1303_s26  ;;  %p1307_p6 = scmp.lt.u32.totalorder %s1303_s26, %s1721_s11 }
 0x607   :  { %p1309_p7 = pnand %p1307_p6, %p1304_p5 }
 0x609   :  { %1312 = shalt.err (!%p1309_p7)
}
 0x60a   :  { %824 = dma.vmem_to_hbm [thread:$0]  %s819_s10, 256, %s1721_s11, [#allocation4], %s1325_s29, %s1325_s29, %s1326_s30  }
 0x60b   :  { %1321 = dma.done.wait [#allocation4], 256  }
 0x60c   :  { %1322 = vsyncadd [#allocation4], 4294967040 }
 0x60d   :  { %828 = vsyncpa [#allocation3], 1 }
 0x60e   :  { %829 = vsyncpa [#allocation6], 1 }
 0x60f   :  { %830 = vsyncpa [#allocation9], 1 }
 0x610   :  { %831 = vsyncpa [#allocation12], 1 }
 0x611   :  { %832 = vsyncpa [#allocation4], 1 }

</bundles_post_ra>
